<compile_context>
chip_gen: v7x
topology: tpu7x:2x2x1
jax: 0.10.0
libtpu: 0.0.40
codegen_flags: <defaults>
</compile_context>

<pallas_src>
import functools

import jax
import jax.numpy as jnp
from jax.experimental import pallas as pl
from jax.experimental.pallas import tpu as pltpu


def _round_up(n: int, m: int) -> int:
    return ((n + m - 1) // m) * m


def _net_kernel(x_ref, w1_ref, b1_ref, w_ref, b_ref, wo_ref, bo_ref, y_ref,
                *, layers: int, negative_slope: float):
    """One packed batch tile of the full MLP; weights stay resident in VMEM."""
    # Hoist all weight/bias loads (JAX does not CSE broadcast_in_dim; doing
    # this once keeps the unrolled loop from re-emitting load+broadcast).
    w1 = w1_ref[...]                      # bf16 [P*d_in, P*nodes] (block-diag)
    w = w_ref[...]                        # bf16 [P*nodes, P*nodes] (block-diag)
    wo = wo_ref[...]                      # bf16 [P*nodes, P]       (block-diag)
    b1 = b1_ref[...]                      # f32  [1, P*nodes]
    b_shared = b_ref[...]                 # f32  [1, P*nodes]
    bo = bo_ref[...]                      # f32  [1, P]

    def leaky_relu(h):
        return jnp.where(h > 0, h, negative_slope * h)

    # fc1 + LeakyReLU  (bf16 MXU inputs, f32 accumulation / elementwise)
    x = x_ref[...].astype(jnp.bfloat16)
    h = jnp.dot(x, w1, preferred_element_type=jnp.float32)
    h = leaky_relu(h + b1)

    # `layers` applications of the *shared* fc layer + LeakyReLU.
    def body(_, h):
        hh = jnp.dot(h.astype(jnp.bfloat16), w,
                     preferred_element_type=jnp.float32)
        return leaky_relu(hh + b_shared)

    h = jax.lax.fori_loop(0, layers, body, h, unroll=True)

    # output head: packed Linear(nodes, 1) + Sigmoid  -> P lanes per row
    a = jnp.dot(h.astype(jnp.bfloat16), wo,
                preferred_element_type=jnp.float32) + bo
    y_ref[...] = jax.nn.sigmoid(a).astype(y_ref.dtype)


def net_forward(x, params, layers: int, *, pack: int = 8, tile_b: int = 16384,
                negative_slope: float = 0.01):
    """x: [B, D_in] float32.  params: dict of weights (see init_params).

    pack:   samples packed per MXU row (8 for v6e/v7x 256-wide MXU,
            4 matches v5e's 128-wide MXU; both are correct everywhere).
    tile_b: batch rows (original, un-packed) per grid step.
    """
    B, d_in = x.shape
    P = int(pack)

    # ---- pack P samples per row ------------------------------------------
    b_pad = _round_up(B, P)
    if b_pad != B:
        x = jnp.pad(x, ((0, b_pad - B), (0, 0)))
    rows = b_pad // P
    xp = x.reshape(rows, P * d_in)        # free, row-major contiguous

    # Block-diagonal packed weights.  Off-diagonal zeros contribute exact 0 to
    # the f32 accumulation, so per-sample math is unchanged.  Built once per
    # call; constant-folds under jit when params are constants.
    eye = jnp.eye(P, dtype=jnp.float32)
    w1 = jnp.kron(eye, params["w1"]).astype(jnp.bfloat16)   # [P*d_in, P*nodes]
    w = jnp.kron(eye, params["w"]).astype(jnp.bfloat16)     # [P*nodes, P*nodes]
    wo = jnp.kron(eye, params["wo"]).astype(jnp.bfloat16)   # [P*nodes, P]
    b1 = jnp.tile(params["b1"], (1, P))                     # f32 [1, P*nodes]
    b = jnp.tile(params["b"], (1, P))                       # f32 [1, P*nodes]
    bo = jnp.tile(params["bo"], (1, P))                     # f32 [1, P]

    # ---- packed-row tiling -------------------------------------------------
    rows8 = _round_up(rows, 8)                   # sublane grain
    tr = max(8, (tile_b // P) // 8 * 8)          # requested packed rows/tile
    tr = min(tr, rows8)
    # v7x megacore: keep >= 2 grid steps when the batch allows it so the
    # "parallel" axis can be sharded across both TensorCores.
    if rows8 >= 16 and pl.cdiv(rows8, tr) < 2:
        tr = _round_up((rows8 + 1) // 2, 8)
    rows_pad = _round_up(rows, tr)
    if rows_pad != rows:
        xp = jnp.pad(xp, ((0, rows_pad - rows), (0, 0)))
    grid = (rows_pad // tr,)

    kernel = functools.partial(_net_kernel, layers=layers,
                               negative_slope=negative_slope)

    # Grid-invariant full-array blocks for weights/biases (resident in VMEM).
    def full(a):
        return pl.BlockSpec(a.shape, lambda i: (0,) * a.ndim)

    out = pl.pallas_call(
        kernel,
        out_shape=jax.ShapeDtypeStruct((rows_pad, P), jnp.float32),
        grid=grid,
        in_specs=[
            pl.BlockSpec((tr, P * d_in), lambda i: (i, 0)),   # packed x tile
            full(w1), full(b1), full(w), full(b), full(wo), full(bo),
        ],
        out_specs=pl.BlockSpec((tr, P), lambda i: (i, 0)),
        compiler_params=pltpu.CompilerParams(
            dimension_semantics=("parallel",)),
    )(xp, w1, b1, w, b, wo, bo)

    # Unpack: row r, lane j  ->  original sample r*P + j.
    return out.reshape(-1, 1)[:B]


def init_params(key, d_in: int, nodes: int):
    """Deterministic synthetic parameters matching nn.Linear shapes.

    Weights are stored [in, out] (transposed vs torch) so the kernel does x@W.
    Biases are stored as [1, out] rows for clean TPU broadcasting.
    """
    k1, k2, k3, k4, k5, k6 = jax.random.split(key, 6)

    def lin(kw, kb, fan_in, fan_out):
        bound = 1.0 / (fan_in ** 0.5)
        wgt = jax.random.uniform(kw, (fan_in, fan_out), jnp.float32, -bound, bound)
        bias = jax.random.uniform(kb, (1, fan_out), jnp.float32, -bound, bound)
        return wgt, bias

    w1, b1 = lin(k1, k2, d_in, nodes)    # fc1
    w, b = lin(k3, k4, nodes, nodes)     # fc (shared across `layers` iters)
    wo, bo = lin(k5, k6, nodes, 1)       # out
    return {"w1": w1, "b1": b1, "w": w, "b": b, "wo": wo, "bo": bo}


def net_forward_ref(x, params, layers: int, matmul_dtype=jnp.float32):
    """Plain-JAX reference.  matmul_dtype=bf16 matches the kernel's precision."""
    leaky = lambda h: jnp.where(h > 0, h, 0.01 * h)

    def dot(a, wgt):
        return jnp.dot(a.astype(matmul_dtype), wgt.astype(matmul_dtype),
                       preferred_element_type=jnp.float32)

    h = leaky(dot(x, params["w1"]) + params["b1"])
    for _ in range(layers):
        h = leaky(dot(h, params["w"]) + params["b"])
    return jax.nn.sigmoid(dot(h, params["wo"]) + params["bo"])


if __name__ == "__main__":
    D_IN, NODES, LAYERS, BATCH = 16, 32, 3, 8

    key = jax.random.PRNGKey(0)
    kx, kp = jax.random.split(key)
    x = jax.random.normal(kx, (BATCH, D_IN), jnp.float32)
    params = init_params(kp, D_IN, NODES)

    # Small-batch run (single packed row, single grid step).
    y = jax.block_until_ready(net_forward(x, params, LAYERS))
    assert y.shape == (BATCH, 1)

    y_ref_match = net_forward_ref(x, params, LAYERS, matmul_dtype=jnp.bfloat16)
    y_ref_f32 = net_forward_ref(x, params, LAYERS, matmul_dtype=jnp.float32)
    assert jnp.allclose(y, y_ref_match, atol=1e-4, rtol=1e-4), (y, y_ref_match)
    assert jnp.allclose(y, y_ref_f32, atol=2e-2, rtol=2e-2), (y, y_ref_f32)

    # Multi-tile grid path: B not a multiple of the pack factor, several tiles.
    B2 = 203
    x2 = jax.random.normal(jax.random.PRNGKey(1), (B2, D_IN), jnp.float32)
    y2 = jax.block_until_ready(net_forward(x2, params, LAYERS, tile_b=64))
    y2_ref = net_forward_ref(x2, params, LAYERS, matmul_dtype=jnp.bfloat16)
    assert y2.shape == (B2, 1)
    assert jnp.allclose(y2, y2_ref, atol=1e-4, rtol=1e-4), (y2, y2_ref)

    # P=4 packing (v5e-sized MXU) sanity check on the same inputs.
    y3 = jax.block_until_ready(net_forward(x2, params, LAYERS, pack=4, tile_b=64))
    assert jnp.allclose(y3, y2_ref, atol=1e-4, rtol=1e-4), (y3, y2_ref)

    print("KERNEL_OK")
</pallas_src>

<mosaic_0001>
module attributes {stable_mosaic.version = 11 : i64} {
  func.func @_net_kernel(%arg0: i32, %arg1: memref<8x128xf32, #tpu.memory_space<vmem>>, %arg2: memref<128x256xbf16, #tpu.memory_space<vmem>>, %arg3: memref<1x256xf32, #tpu.memory_space<vmem>>, %arg4: memref<256x256xbf16, #tpu.memory_space<vmem>>, %arg5: memref<1x256xf32, #tpu.memory_space<vmem>>, %arg6: memref<256x8xbf16, #tpu.memory_space<vmem>>, %arg7: memref<1x8xf32, #tpu.memory_space<vmem>>, %arg8: memref<8x8xf32, #tpu.memory_space<vmem>>) attributes {dimension_semantics = [#tpu.dimension_semantics<parallel>], iteration_bounds = array<i64: 1>, scalar_prefetch = 0 : i64, scratch_operands = 0 : i64, tpu.core_type = #tpu.core_type<tc>, window_params = [{transform_indices = @transform_0, window_bounds = array<i64: 8, 128>}, {pipeline_mode = #tpu.pipeline_mode<synchronous>, transform_indices = @transform_1, window_bounds = array<i64: 128, 256>}, {pipeline_mode = #tpu.pipeline_mode<synchronous>, transform_indices = @transform_2, window_bounds = array<i64: 1, 256>}, {pipeline_mode = #tpu.pipeline_mode<synchronous>, transform_indices = @transform_3, window_bounds = array<i64: 256, 256>}, {pipeline_mode = #tpu.pipeline_mode<synchronous>, transform_indices = @transform_4, window_bounds = array<i64: 1, 256>}, {pipeline_mode = #tpu.pipeline_mode<synchronous>, transform_indices = @transform_5, window_bounds = array<i64: 256, 8>}, {pipeline_mode = #tpu.pipeline_mode<synchronous>, transform_indices = @transform_6, window_bounds = array<i64: 1, 8>}, {transform_indices = @transform_7, window_bounds = array<i64: 8, 8>}]} {
    %c0 = arith.constant 0 : index
    %c0_0 = arith.constant 0 : index
    %0 = vector.load %arg2[%c0, %c0_0] : memref<128x256xbf16, #tpu.memory_space<vmem>>, vector<128x256xbf16>
    %c0_1 = arith.constant 0 : index
    %c0_2 = arith.constant 0 : index
    %1 = vector.load %arg4[%c0_1, %c0_2] : memref<256x256xbf16, #tpu.memory_space<vmem>>, vector<256x256xbf16>
    %c0_3 = arith.constant 0 : index
    %c0_4 = arith.constant 0 : index
    %2 = vector.load %arg6[%c0_3, %c0_4] : memref<256x8xbf16, #tpu.memory_space<vmem>>, vector<256x8xbf16>
    %c0_5 = arith.constant 0 : index
    %c0_6 = arith.constant 0 : index
    %3 = vector.load %arg3[%c0_5, %c0_6] : memref<1x256xf32, #tpu.memory_space<vmem>>, vector<1x256xf32>
    %c0_7 = arith.constant 0 : index
    %c0_8 = arith.constant 0 : index
    %4 = vector.load %arg5[%c0_7, %c0_8] : memref<1x256xf32, #tpu.memory_space<vmem>>, vector<1x256xf32>
    %c0_9 = arith.constant 0 : index
    %c0_10 = arith.constant 0 : index
    %5 = vector.load %arg7[%c0_9, %c0_10] : memref<1x8xf32, #tpu.memory_space<vmem>>, vector<1x8xf32>
    %c0_11 = arith.constant 0 : index
    %c0_12 = arith.constant 0 : index
    %6 = vector.load %arg1[%c0_11, %c0_12] : memref<8x128xf32, #tpu.memory_space<vmem>>, vector<8x128xf32>
    %7 = arith.truncf %6 : vector<8x128xf32> to vector<8x128xbf16>
    %cst = arith.constant dense<0.000000e+00> : vector<8x256xf32>
    %8 = tpu.matmul %7, %0, %cst {dimension_numbers = #tpu.dot_dimension_numbers<[1], [0], [0], [1], [0, 0, 1, 1], [], []>} : vector<8x128xbf16>, vector<128x256xbf16>, vector<8x256xf32> -> vector<8x256xf32>
    %9 = vector.broadcast %3 : vector<1x256xf32> to vector<8x256xf32>
    %10 = arith.addf %8, %9 : vector<8x256xf32>
    %cst_13 = arith.constant 0.000000e+00 : f32
    %11 = vector.broadcast %cst_13 : f32 to vector<8x256xf32>
    %12 = arith.cmpf ogt, %10, %11 : vector<8x256xf32>
    %cst_14 = arith.constant 0.00999999977 : f32
    %13 = vector.broadcast %cst_14 : f32 to vector<8x256xf32>
    %14 = arith.mulf %13, %10 : vector<8x256xf32>
    %15 = arith.select %12, %10, %14 : vector<8x256xi1>, vector<8x256xf32>
    %c0_i32 = arith.constant 0 : i32
    %16 = arith.truncf %15 : vector<8x256xf32> to vector<8x256xbf16>
    %cst_15 = arith.constant dense<0.000000e+00> : vector<8x256xf32>
    %17 = tpu.matmul %16, %1, %cst_15 {dimension_numbers = #tpu.dot_dimension_numbers<[1], [0], [0], [1], [0, 0, 1, 1], [], []>} : vector<8x256xbf16>, vector<256x256xbf16>, vector<8x256xf32> -> vector<8x256xf32>
    %18 = vector.broadcast %4 : vector<1x256xf32> to vector<8x256xf32>
    %19 = arith.addf %17, %18 : vector<8x256xf32>
    %cst_16 = arith.constant 0.000000e+00 : f32
    %20 = vector.broadcast %cst_16 : f32 to vector<8x256xf32>
    %21 = arith.cmpf ogt, %19, %20 : vector<8x256xf32>
    %cst_17 = arith.constant 0.00999999977 : f32
    %22 = vector.broadcast %cst_17 : f32 to vector<8x256xf32>
    %23 = arith.mulf %22, %19 : vector<8x256xf32>
    %24 = arith.select %21, %19, %23 : vector<8x256xi1>, vector<8x256xf32>
    %c1_i32 = arith.constant 1 : i32
    %25 = arith.truncf %24 : vector<8x256xf32> to vector<8x256xbf16>
    %cst_18 = arith.constant dense<0.000000e+00> : vector<8x256xf32>
    %26 = tpu.matmul %25, %1, %cst_18 {dimension_numbers = #tpu.dot_dimension_numbers<[1], [0], [0], [1], [0, 0, 1, 1], [], []>} : vector<8x256xbf16>, vector<256x256xbf16>, vector<8x256xf32> -> vector<8x256xf32>
    %27 = vector.broadcast %4 : vector<1x256xf32> to vector<8x256xf32>
    %28 = arith.addf %26, %27 : vector<8x256xf32>
    %cst_19 = arith.constant 0.000000e+00 : f32
    %29 = vector.broadcast %cst_19 : f32 to vector<8x256xf32>
    %30 = arith.cmpf ogt, %28, %29 : vector<8x256xf32>
    %cst_20 = arith.constant 0.00999999977 : f32
    %31 = vector.broadcast %cst_20 : f32 to vector<8x256xf32>
    %32 = arith.mulf %31, %28 : vector<8x256xf32>
    %33 = arith.select %30, %28, %32 : vector<8x256xi1>, vector<8x256xf32>
    %c2_i32 = arith.constant 2 : i32
    %34 = arith.truncf %33 : vector<8x256xf32> to vector<8x256xbf16>
    %cst_21 = arith.constant dense<0.000000e+00> : vector<8x256xf32>
    %35 = tpu.matmul %34, %1, %cst_21 {dimension_numbers = #tpu.dot_dimension_numbers<[1], [0], [0], [1], [0, 0, 1, 1], [], []>} : vector<8x256xbf16>, vector<256x256xbf16>, vector<8x256xf32> -> vector<8x256xf32>
    %36 = vector.broadcast %4 : vector<1x256xf32> to vector<8x256xf32>
    %37 = arith.addf %35, %36 : vector<8x256xf32>
    %cst_22 = arith.constant 0.000000e+00 : f32
    %38 = vector.broadcast %cst_22 : f32 to vector<8x256xf32>
    %39 = arith.cmpf ogt, %37, %38 : vector<8x256xf32>
    %cst_23 = arith.constant 0.00999999977 : f32
    %40 = vector.broadcast %cst_23 : f32 to vector<8x256xf32>
    %41 = arith.mulf %40, %37 : vector<8x256xf32>
    %42 = arith.select %39, %37, %41 : vector<8x256xi1>, vector<8x256xf32>
    %43 = arith.truncf %42 : vector<8x256xf32> to vector<8x256xbf16>
    %cst_24 = arith.constant dense<0.000000e+00> : vector<8x8xf32>
    %44 = tpu.matmul %43, %2, %cst_24 {dimension_numbers = #tpu.dot_dimension_numbers<[1], [0], [0], [1], [0, 0, 1, 1], [], []>} : vector<8x256xbf16>, vector<256x8xbf16>, vector<8x8xf32> -> vector<8x8xf32>
    %45 = vector.broadcast %5 : vector<1x8xf32> to vector<8x8xf32>
    %46 = arith.addf %44, %45 : vector<8x8xf32>
    %47 = arith.negf %46 : vector<8x8xf32>
    %48 = math.exp %47 : vector<8x8xf32>
    %cst_25 = arith.constant 1.000000e+00 : f32
    %49 = vector.broadcast %cst_25 : f32 to vector<8x8xf32>
    %50 = arith.addf %49, %48 : vector<8x8xf32>
    %51 = arith.divf %49, %50 : vector<8x8xf32>
    %c0_26 = arith.constant 0 : index
    %c0_27 = arith.constant 0 : index
    %52 = vector.load %arg8[%c0_26, %c0_27] : memref<8x8xf32, #tpu.memory_space<vmem>>, vector<8x8xf32>
    tpu.vector_store %arg8[%c0_26, %c0_27], %51 {strides = array<i32>} : memref<8x8xf32, #tpu.memory_space<vmem>>, vector<8x8xf32>,
    return
  }
  func.func @transform_0(%arg0: i32) -> (i32, i32) {
    %c0_i32 = arith.constant 0 : i32
    %c0_i32_0 = arith.constant 0 : i32
    return %arg0, %c0_i32 : i32, i32
  }
  func.func @transform_1(%arg0: i32) -> (i32, i32) {
    %c0_i32 = arith.constant 0 : i32
    %c0_i32_0 = arith.constant 0 : i32
    %c0_i32_1 = arith.constant 0 : i32
    return %c0_i32, %c0_i32_0 : i32, i32
  }
  func.func @transform_2(%arg0: i32) -> (i32, i32) {
    %c0_i32 = arith.constant 0 : i32
    %c0_i32_0 = arith.constant 0 : i32
    %c0_i32_1 = arith.constant 0 : i32
    return %c0_i32, %c0_i32_0 : i32, i32
  }
  func.func @transform_3(%arg0: i32) -> (i32, i32) {
    %c0_i32 = arith.constant 0 : i32
    %c0_i32_0 = arith.constant 0 : i32
    %c0_i32_1 = arith.constant 0 : i32
    return %c0_i32, %c0_i32_0 : i32, i32
  }
  func.func @transform_4(%arg0: i32) -> (i32, i32) {
    %c0_i32 = arith.constant 0 : i32
    %c0_i32_0 = arith.constant 0 : i32
    %c0_i32_1 = arith.constant 0 : i32
    return %c0_i32, %c0_i32_0 : i32, i32
  }
  func.func @transform_5(%arg0: i32) -> (i32, i32) {
    %c0_i32 = arith.constant 0 : i32
    %c0_i32_0 = arith.constant 0 : i32
    %c0_i32_1 = arith.constant 0 : i32
    return %c0_i32, %c0_i32_0 : i32, i32
  }
  func.func @transform_6(%arg0: i32) -> (i32, i32) {
    %c0_i32 = arith.constant 0 : i32
    %c0_i32_0 = arith.constant 0 : i32
    %c0_i32_1 = arith.constant 0 : i32
    return %c0_i32, %c0_i32_0 : i32, i32
  }
  func.func @transform_7(%arg0: i32) -> (i32, i32) {
    %c0_i32 = arith.constant 0 : i32
    %c0_i32_0 = arith.constant 0 : i32
    return %arg0, %c0_i32 : i32, i32
  }
}

</mosaic_0001>

<bundles_post_ra>
// kernel: tpu_custom_call.1
= control target key start
LH: loop header
LB: loop body
LE: loop exit
PB: predicated region body
PF: predicated region fallthrough
CT: control target
= control target key end

     0   :  { %12 = vsyncpa [#allocation3], 0  ;;  %s1310_s0 = inlined_call_operand.vmem [shape: f32[8,128], index: 0, kind: input, shape index: {}]   ;;  %s1311_s1 = inlined_call_operand.vmem [shape: bf16[128,256], index: 1, kind: input, shape index: {}]   ;;  %s1312_s2 = inlined_call_operand.vmem [shape: f32[1,256], index: 2, kind: input, shape index: {}]   ;;  %s1313_s3 = inlined_call_operand.hbm [shape: bf16[256,256], index: 3, kind: input, shape index: {}]   ;;  %s1314_s4 = inlined_call_operand.vmem [shape: f32[1,256], index: 4, kind: input, shape index: {}]   ;;  %s1315_s5 = inlined_call_operand.vmem [shape: bf16[256,8], index: 5, kind: input, shape index: {}]   ;;  %s1316_s6 = inlined_call_operand.vmem [shape: f32[1,8], index: 6, kind: input, shape index: {}]   ;;  %s1317_s7 = inlined_call_operand.hbm [shape: f32[8,8], index: 7, kind: output, shape index: {}]  }
   0x1   :  { %13 = vsyncpa [#allocation4], 0  ;;  %s983_s24 = smov [#allocation2]   ;;  %s935_s28 = scalar_lea.hbm %s1313_s3, 4096 }
   0x2   :  { %s25_s25 = sshll.u32 %s983_s24, 4  ;;  %p936_p0 = scmp.ne.s32.totalorder %s1313_s3, %s935_s28  ;;  %s26_s25 = int_to_ptr.vmem [resolvable:$true] %s25_s25 }
   0x3   :  { %p939_p1 = scmp.lt.u32.totalorder %s935_s28, %s1313_s3 }
   0x5   :  { %p941_p2 = pnand %p939_p1, %p936_p0 }
   0x7   :  { %944 = shalt.err (!%p941_p2)
}
   0x8   :  { %s945_s10 = scalar_lea.vmem %s26_s25, 4096  ;;  %p950_p4 = scmp.lt.s32.totalorder %s26_s25, %s26_s25 }
   0x9   :  { %p946_p3 = scmp.ne.s32.totalorder %s26_s25, %s945_s10  ;;  %p951_p5 = scmp.lt.s32.totalorder %s945_s10, %s945_s10 }
   0xb   :  { %p952_p6 = por %p951_p5, %p950_p4 }
   0xd   :  { %p953_p7 = pnand %p952_p6, %p946_p3 }
   0xf   :  { %956 = shalt.err (!%p953_p7)
}
  0x10   :  { %s984_s11 = smov 128   ;;  %s985_s12 = smov 8  }
  0x11   :  { %31 = dma.hbm_to_vmem [thread:$0]  %s1313_s3, 4096, %s26_s25, [#allocation3], %s984_s11, %s984_s11, %s985_s12  }
  0x12   :  { %979 = dma.done.wait [#allocation3], 4096  }
  0x13   :  { %980 = vsyncadd [#allocation3], 4294963200  ;;  %v986_v0 = vmov 0   ;;  %v843_v1 = vld [vmem:[%s1311_s1 + $0x4] ss:$8 sps:$4 sm:$0xff]   ;;  %v128_v51 = vlaneseq  ;;  %s987_s29 = smov [#allocation5]  }
  0x14   :  { %250 = vmatprep.mubr.bf16.mxu0 %v986_v0  ;;  %v845_v2 = vld [vmem:[%s1311_s1] ss:$8 sps:$4 sm:$0xff]   ;;  %218 = vmatprep.subr.bf16.mxu0 %v843_v1  ;;  %v846_v3 = vld [vmem:[%s1311_s1 + $0x14] ss:$8 sps:$4 sm:$0xff]   ;;  %v848_v4 = vld [vmem:[%s1311_s1 + $0x10] ss:$8 sps:$4 sm:$0xff]  }
  0x15   :  { %219 = vmatpush1.bf16.msra.mxu0 %v845_v2  ;;  %v849_v5 = vld [vmem:[%s1311_s1 + $0x24] ss:$8 sps:$4 sm:$0xff]   ;;  %v851_v6 = vld [vmem:[%s1311_s1 + $0x20] ss:$8 sps:$4 sm:$0xff]   ;;  %v852_v7 = vld [vmem:[%s1311_s1 + $0x34] ss:$8 sps:$4 sm:$0xff]  }
  0x16   :  { %220 = vmatprep.subr.bf16.mxu0 %v846_v3  ;;  %v854_v8 = vld [vmem:[%s1311_s1 + $0x30] ss:$8 sps:$4 sm:$0xff]   ;;  %v855_v9 = vld [vmem:[%s1311_s1 + $0x44] ss:$8 sps:$4 sm:$0xff]   ;;  %v1069_v11 = vld [vmem:[#allocation2] ss:$8 sps:$4 sm:$0xff]  }
  0x17   :  { %v1067_v10 = vld [vmem:[#allocation2 + $0x4] ss:$8 sps:$4 sm:$0xff]   ;;  %v1072_v12 = vld [vmem:[#allocation2 + $0x14] ss:$8 sps:$4 sm:$0xff]   ;;  %v857_v13 = vld [vmem:[%s1311_s1 + $0x40] ss:$8 sps:$4 sm:$0xff]  }
  0x18   :  { %438 = vmatprep.subr.bf16.mxu1 %v1067_v10  ;;  %v1078_v14 = vld [vmem:[#allocation2 + $0x10] ss:$8 sps:$4 sm:$0xff]   ;;  %v1081_v15 = vld [vmem:[#allocation2 + $0x24] ss:$8 sps:$4 sm:$0xff]   ;;  %v858_v16 = vld [vmem:[%s1311_s1 + $0x54] ss:$8 sps:$4 sm:$0xff]  }
  0x19   :  { %221 = vmatpush1.bf16.msra.mxu0 %v848_v4  ;;  %439 = vmatpush1.bf16.msra.mxu1 %v1069_v11  ;;  %v860_v17 = vld [vmem:[%s1311_s1 + $0x50] ss:$8 sps:$4 sm:$0xff]   ;;  %v1090_v18 = vld [vmem:[#allocation2 + $0x20] ss:$8 sps:$4 sm:$0xff]   ;;  %v1093_v19 = vld [vmem:[#allocation2 + $0x34] ss:$8 sps:$4 sm:$0xff]  }
  0x1a   :  { %222 = vmatprep.subr.bf16.mxu0 %v849_v5  ;;  %440 = vmatprep.subr.bf16.mxu1 %v1072_v12  ;;  %v861_v20 = vld [vmem:[%s1311_s1 + $0x64] ss:$8 sps:$4 sm:$0xff]   ;;  %v863_v21 = vld [vmem:[%s1311_s1 + $0x60] ss:$8 sps:$4 sm:$0xff]   ;;  %v1102_v22 = vld [vmem:[#allocation2 + $0x30] ss:$8 sps:$4 sm:$0xff]  }
  0x1b   :  { %v1105_v23 = vld [vmem:[#allocation2 + $0x44] ss:$8 sps:$4 sm:$0xff]   ;;  %v864_v24 = vld [vmem:[%s1311_s1 + $0x74] ss:$8 sps:$4 sm:$0xff]   ;;  %v866_v25 = vld [vmem:[%s1311_s1 + $0x70] ss:$8 sps:$4 sm:$0xff]  }
  0x1c   :  { %v125_v26 = vld [vmem:[%s1310_s0] sm:$0xff]  ;;  %v1120_v28 = vld [vmem:[#allocation2 + $0x54] ss:$8 sps:$4 sm:$0xff]   ;;  %v1122_v29 = vld [vmem:[#allocation2 + $0x50] ss:$8 sps:$4 sm:$0xff]   ;;  %v129_v52 = vshrl.u32 %v128_v51, 7 }
  0x1d   :  { %223 = vmatpush1.bf16.msra.mxu0 %v851_v6  ;;  %441 = vmatpush1.bf16.msra.mxu1 %v1078_v14  ;;  %v1117_v27 = vld [vmem:[#allocation2 + $0x40] ss:$8 sps:$4 sm:$0xff]   ;;  %v1124_v30 = vld [vmem:[#allocation2 + $0x64] ss:$8 sps:$4 sm:$0xff]   ;;  %v126_v31 = vpack.c.bf16 %v125_v26, %v125_v26  ;;  %v1131_v33 = vld [vmem:[#allocation2 + $0x74] ss:$8 sps:$4 sm:$0xff]  }
  0x1e   :  { %224 = vmatprep.subr.bf16.mxu0 %v852_v7  ;;  %442 = vmatprep.subr.bf16.mxu1 %v1081_v15  ;;  %v1128_v32 = vld [vmem:[#allocation2 + $0x60] ss:$8 sps:$4 sm:$0xff]   ;;  %v1136_v34 = vld [vmem:[#allocation2 + $0x70] ss:$8 sps:$4 sm:$0xff]   ;;  %v1139_v35 = vld [vmem:[#allocation2 + $0x84] ss:$8 sps:$4 sm:$0xff]  }
  0x1f   :  { %v1146_v36 = vld [vmem:[#allocation2 + $0x80] ss:$8 sps:$4 sm:$0xff]   ;;  %v1149_v37 = vld [vmem:[#allocation2 + $0x94] ss:$8 sps:$4 sm:$0xff]   ;;  %v1154_v38 = vld [vmem:[#allocation2 + $0x90] ss:$8 sps:$4 sm:$0xff]  }
  0x20   :  { %v1157_v39 = vld [vmem:[#allocation2 + $0xa4] ss:$8 sps:$4 sm:$0xff]   ;;  %v1162_v40 = vld [vmem:[#allocation2 + $0xa0] ss:$8 sps:$4 sm:$0xff]   ;;  %v1165_v41 = vld [vmem:[#allocation2 + $0xb4] ss:$8 sps:$4 sm:$0xff]  }
  0x21   :  { %225 = vmatpush1.bf16.msra.mxu0 %v854_v8  ;;  %443 = vmatpush1.bf16.msra.mxu1 %v1090_v18  ;;  %v1170_v42 = vld [vmem:[#allocation2 + $0xb0] ss:$8 sps:$4 sm:$0xff]   ;;  %v1173_v43 = vld [vmem:[#allocation2 + $0xc4] ss:$8 sps:$4 sm:$0xff]   ;;  %v1178_v44 = vld [vmem:[#allocation2 + $0xc0] ss:$8 sps:$4 sm:$0xff]  }
  0x22   :  { %226 = vmatprep.subr.bf16.mxu0 %v855_v9  ;;  %444 = vmatprep.subr.bf16.mxu1 %v1093_v19  ;;  %v1181_v45 = vld [vmem:[#allocation2 + $0xd4] ss:$8 sps:$4 sm:$0xff]   ;;  %v1186_v46 = vld [vmem:[#allocation2 + $0xd0] ss:$8 sps:$4 sm:$0xff]   ;;  %v909_v47 = vld [vmem:[#allocation2 + $0xe4] ss:$8 sps:$4 sm:$0xff]  }
  0x23   :  { %v911_v48 = vld [vmem:[#allocation2 + $0xe0] ss:$8 sps:$4 sm:$0xff]   ;;  %v912_v49 = vld [vmem:[#allocation2 + $0xf4] ss:$8 sps:$4 sm:$0xff]   ;;  %v914_v50 = vld [vmem:[#allocation2 + $0xf0] ss:$8 sps:$4 sm:$0xff]  }
  0x24   :  { %v130_v53 = vsub.s32 0, %v129_v52  ;;  %v122_v54 = vld [vmem:[%s1312_s2] sm:$0x3]  ;;  %v134_v55 = vsub.s32 1, %v129_v52  ;;  %v920_v26 = vld [vmem:[%s1315_s5 + $0x10] sm:$0xff]   ;;  %s741_s30 = sshll.u32 %s987_s29, 4  ;;  %s742_s30 = int_to_ptr.vmem [resolvable:$true] %s741_s30 }
  0x25   :  { %227 = vmatpush1.bf16.msra.mxu0 %v857_v13  ;;  %445 = vmatpush1.bf16.msra.mxu1 %v1102_v22  ;;  %v123_v6 = vld [vmem:[%s1314_s4] sm:$0x3]  ;;  %vm733_vm8 = vcmask 64512   ;;  %s957_s8 = scalar_lea.vmem %s742_s30, 128  ;;  %p962_p9 = scmp.lt.s32.totalorder %s742_s30, %s742_s30 }
  0x26   :  { %228 = vmatprep.subr.bf16.mxu0 %v858_v16  ;;  %446 = vmatprep.subr.bf16.mxu1 %v1105_v23  ;;  %v131_v56 = vrot.slane %v122_v54, %v130_v53  ;;  %v135_v57 = vrot.slane %v122_v54, %v134_v55  ;;  %v1237_v7 = vrot.slane %v123_v6, %v130_v53  ;;  %p958_p8 = scmp.ne.s32.totalorder %s742_s30, %s957_s8  ;;  %p963_p10 = scmp.lt.s32.totalorder %s957_s8, %s957_s8 }
  0x27   :  { %v1239_v8 = vrot.slane %v123_v6, %v134_v55 }
  0x28   :  { %p964_p11 = por %p963_p10, %p962_p9 }
  0x29   :  { %229 = vmatpush1.bf16.msra.mxu0 %v860_v17  ;;  %447 = vmatpush1.bf16.msra.mxu1 %v1117_v27 }
  0x2a   :  { %230 = vmatprep.subr.bf16.mxu0 %v861_v20  ;;  %448 = vmatprep.subr.bf16.mxu1 %v1120_v28  ;;  %p965_p12 = pnand %p964_p11, %p958_p8 }
  0x2d   :  { %231 = vmatpush1.bf16.msra.mxu0 %v863_v21  ;;  %449 = vmatpush1.bf16.msra.mxu1 %v1122_v29  ;;  %v915_v21 = vld [vmem:[%s1315_s5 + $0x40] sm:$0xff]  }
  0x2e   :  { %232 = vmatprep.subr.bf16.mxu0 %v864_v24  ;;  %450 = vmatprep.subr.bf16.mxu1 %v1124_v30  ;;  %v918_v24 = vld [vmem:[%s1315_s5 + $0x8] sm:$0xff]  }
  0x31   :  { %233 = vmatpush1.bf16.msra.mxu0 %v866_v25  ;;  %451 = vmatpush1.bf16.msra.mxu1 %v1128_v32  ;;  %v919_v25 = vld [vmem:[%s1315_s5 + $0x50] sm:$0xff]  }
  0x32   :  { %487 = vmatprep.subr.bf16.mxu0 %v1067_v10  ;;  %452 = vmatprep.subr.bf16.mxu1 %v1131_v33 }
  0x34   :  { %251 = vmatmul.mubr.bf16.vlgmr.msra.gmra.mrb[0].mxu0 %v126_v31  ;;  %v925_v31 = vld [vmem:[%s1315_s5 + $0x68] sm:$0xff]  }
  0x35   :  { %488 = vmatpush1.bf16.msra.mxu0 %v1069_v11  ;;  %453 = vmatpush1.bf16.msra.mxu1 %v1136_v34 }
  0x36   :  { %489 = vmatprep.subr.bf16.mxu0 %v1072_v12  ;;  %454 = vmatprep.subr.bf16.mxu1 %v1139_v35 }
  0x39   :  { %490 = vmatpush1.bf16.msra.mxu0 %v1078_v14  ;;  %455 = vmatpush1.bf16.msra.mxu1 %v1146_v36 }
  0x3a   :  { %491 = vmatprep.subr.bf16.mxu0 %v1081_v15  ;;  %456 = vmatprep.subr.bf16.mxu1 %v1149_v37 }
  0x3d   :  { %492 = vmatpush1.bf16.msra.mxu0 %v1090_v18  ;;  %457 = vmatpush1.bf16.msra.mxu1 %v1154_v38 }
  0x3e   :  { %493 = vmatprep.subr.bf16.mxu0 %v1093_v19  ;;  %458 = vmatprep.subr.bf16.mxu1 %v1157_v39 }
  0x41   :  { %494 = vmatpush1.bf16.msra.mxu0 %v1102_v22  ;;  %459 = vmatpush1.bf16.msra.mxu1 %v1162_v40 }
  0x42   :  { %495 = vmatprep.subr.bf16.mxu0 %v1105_v23  ;;  %460 = vmatprep.subr.bf16.mxu1 %v1165_v41 }
  0x45   :  { %496 = vmatpush1.bf16.msra.mxu0 %v1117_v27  ;;  %461 = vmatpush1.bf16.msra.mxu1 %v1170_v42 }
  0x46   :  { %497 = vmatprep.subr.bf16.mxu0 %v1120_v28  ;;  %462 = vmatprep.subr.bf16.mxu1 %v1173_v43 }
  0x49   :  { %498 = vmatpush1.bf16.msra.mxu0 %v1122_v29  ;;  %463 = vmatpush1.bf16.msra.mxu1 %v1178_v44 }
  0x4a   :  { %499 = vmatprep.subr.bf16.mxu0 %v1124_v30  ;;  %464 = vmatprep.subr.bf16.mxu1 %v1181_v45 }
  0x4d   :  { %500 = vmatpush1.bf16.msra.mxu0 %v1128_v32  ;;  %465 = vmatpush1.bf16.msra.mxu1 %v1186_v46 }
  0x4e   :  { %501 = vmatprep.subr.bf16.mxu0 %v1131_v33  ;;  %466 = vmatprep.subr.bf16.mxu1 %v909_v47 }
  0x51   :  { %502 = vmatpush1.bf16.msra.mxu0 %v1136_v34  ;;  %467 = vmatpush1.bf16.msra.mxu1 %v911_v48 }
  0x52   :  { %503 = vmatprep.subr.bf16.mxu0 %v1139_v35  ;;  %468 = vmatprep.subr.bf16.mxu1 %v912_v49 }
  0x55   :  { %504 = vmatpush1.bf16.msra.mxu0 %v1146_v36  ;;  %469 = vmatpush1.bf16.msra.mxu1 %v914_v50 }
  0x56   :  { %505 = vmatprep.subr.bf16.mxu0 %v1149_v37  ;;  %536 = vmatprep.subr.bf16.mxu1 %v1067_v10 }
  0x59   :  { %506 = vmatpush1.bf16.msra.mxu0 %v1154_v38 }
  0x5a   :  { %507 = vmatprep.subr.bf16.mxu0 %v1157_v39 }
  0x5d   :  { %508 = vmatpush1.bf16.msra.mxu0 %v1162_v40 }
  0x5e   :  { %509 = vmatprep.subr.bf16.mxu0 %v1165_v41 }
  0x61   :  { %510 = vmatpush1.bf16.msra.mxu0 %v1170_v42 }
  0x62   :  { %511 = vmatprep.subr.bf16.mxu0 %v1173_v43 }
  0x65   :  { %512 = vmatpush1.bf16.msra.mxu0 %v1178_v44 }
  0x66   :  { %513 = vmatprep.subr.bf16.mxu0 %v1181_v45 }
  0x69   :  { %514 = vmatpush1.bf16.msra.mxu0 %v1186_v46 }
  0x6a   :  { %515 = vmatprep.subr.bf16.mxu0 %v909_v47 }
  0x6d   :  { %516 = vmatpush1.bf16.msra.mxu0 %v911_v48 }
  0x6e   :  { %517 = vmatprep.subr.bf16.mxu0 %v912_v49 }
  0x71   :  { %518 = vmatpush1.bf16.msra.mxu0 %v914_v50 }
  0x72   :  { %816 = vmatprep.subr.bf16.mxu0 %v915_v21 }
 0x107   :  { %v252_v58 = vpop.f32.mrb[0].mxu0 }
 0x108   :  { %v253_v59 = vadd.f32 %v252_v58, %v131_v56  ;;  %v254_v60 = vpop.f32.mrb[1].mxu0 }
 0x109   :  { %v255_v61 = vadd.f32 %v254_v60, %v135_v57  ;;  %v256_v62 = vpop.f32.mrb[2].mxu0 }
 0x10a   :  { %vm259_vm0 = vcmp.gt.f32.partialorder %v253_v59, 0.0  ;;  %v261_v63 = vmul.f32 0.01, %v253_v59  ;;  %v257_v0 = vpop.f32.mrb[3].mxu0  ;;  %v798_v62 = vld [vmem:[%s1316_s6] ss:$0 sm:$0xff] }
 0x10b   :  { %vm260_vm1 = vcmp.gt.f32.partialorder %v255_v61, 0.0  ;;  %v262_v1 = vmul.f32 0.01, %v255_v61 }
 0x10c   :  { %v263_v2 = vsel %vm259_vm0, %v253_v59, %v261_v63 }
 0x10d   :  { %v264_v3 = vsel %vm260_vm1, %v255_v61, %v262_v1  ;;  %v265_v5 = vpack.c.bf16 %v263_v2, %v263_v2 }
 0x10e   :  { %v266_v4 = vpack.c.bf16 %v264_v3, %v264_v3 }
 0x110   :  { %470 = vmatprep.mubr.bf16.mxu1 %v266_v4 }
 0x111   :  { %471 = vmatmul.mubr.bf16.vlgmr.msra.gmra.mrb[0].mxu1 %v265_v5 }
 0x112   :  { %537 = vmatpush1.bf16.msra.mxu1 %v1069_v11 }
 0x113   :  { %538 = vmatprep.subr.bf16.mxu1 %v1072_v12 }
 0x116   :  { %539 = vmatpush1.bf16.msra.mxu1 %v1078_v14 }
 0x117   :  { %540 = vmatprep.subr.bf16.mxu1 %v1081_v15 }
 0x11a   :  { %541 = vmatpush1.bf16.msra.mxu1 %v1090_v18 }
 0x11b   :  { %542 = vmatprep.subr.bf16.mxu1 %v1093_v19 }
 0x11e   :  { %543 = vmatpush1.bf16.msra.mxu1 %v1102_v22  ;;  %v916_v22 = vld [vmem:[%s1315_s5] sm:$0xff]  }
 0x11f   :  { %544 = vmatprep.subr.bf16.mxu1 %v1105_v23  ;;  %v917_v23 = vld [vmem:[%s1315_s5 + $0x48] sm:$0xff]  }
 0x122   :  { %545 = vmatpush1.bf16.msra.mxu1 %v1117_v27  ;;  %v921_v27 = vld [vmem:[%s1315_s5 + $0x58] sm:$0xff]  }
 0x123   :  { %546 = vmatprep.subr.bf16.mxu1 %v1120_v28  ;;  %v922_v28 = vld [vmem:[%s1315_s5 + $0x18] sm:$0xff]  }
 0x126   :  { %547 = vmatpush1.bf16.msra.mxu1 %v1122_v29  ;;  %v923_v29 = vld [vmem:[%s1315_s5 + $0x60] sm:$0xff]  }
 0x127   :  { %548 = vmatprep.subr.bf16.mxu1 %v1124_v30  ;;  %v924_v30 = vld [vmem:[%s1315_s5 + $0x20] sm:$0xff]  }
 0x12a   :  { %549 = vmatpush1.bf16.msra.mxu1 %v1128_v32  ;;  %v926_v32 = vld [vmem:[%s1315_s5 + $0x28] sm:$0xff]  }
 0x12b   :  { %550 = vmatprep.subr.bf16.mxu1 %v1131_v33 }
 0x12e   :  { %551 = vmatpush1.bf16.msra.mxu1 %v1136_v34 }
 0x12f   :  { %552 = vmatprep.subr.bf16.mxu1 %v1139_v35 }
 0x132   :  { %553 = vmatpush1.bf16.msra.mxu1 %v1146_v36 }
 0x133   :  { %554 = vmatprep.subr.bf16.mxu1 %v1149_v37 }
 0x136   :  { %555 = vmatpush1.bf16.msra.mxu1 %v1154_v38 }
 0x137   :  { %556 = vmatprep.subr.bf16.mxu1 %v1157_v39 }
 0x13a   :  { %557 = vmatpush1.bf16.msra.mxu1 %v1162_v40 }
 0x13b   :  { %558 = vmatprep.subr.bf16.mxu1 %v1165_v41 }
 0x13e   :  { %559 = vmatpush1.bf16.msra.mxu1 %v1170_v42 }
 0x13f   :  { %560 = vmatprep.subr.bf16.mxu1 %v1173_v43 }
 0x142   :  { %561 = vmatpush1.bf16.msra.mxu1 %v1178_v44 }
 0x143   :  { %562 = vmatprep.subr.bf16.mxu1 %v1181_v45  ;;  %v927_v45 = vld [vmem:[%s1315_s5 + $0x70] sm:$0xff]  }
 0x146   :  { %563 = vmatpush1.bf16.msra.mxu1 %v1186_v46  ;;  %v928_v46 = vld [vmem:[%s1315_s5 + $0x30] sm:$0xff]  }
 0x147   :  { %564 = vmatprep.subr.bf16.mxu1 %v909_v47  ;;  %v929_v47 = vld [vmem:[%s1315_s5 + $0x78] sm:$0xff]  }
 0x14a   :  { %565 = vmatpush1.bf16.msra.mxu1 %v911_v48  ;;  %v930_v48 = vld [vmem:[%s1315_s5 + $0x38] sm:$0xff]  }
 0x14b   :  { %566 = vmatprep.subr.bf16.mxu1 %v912_v49 }
 0x14e   :  { %567 = vmatpush1.bf16.msra.mxu1 %v914_v50 }
 0x1e4   :  { %v472_v9 = vpop.f32.mrb[0].mxu1 }
 0x1e5   :  { %v473_v10 = vadd.f32 %v472_v9, %v1237_v7  ;;  %v474_v11 = vpop.f32.mrb[1].mxu1 }
 0x1e6   :  { %v475_v12 = vadd.f32 %v474_v11, %v1239_v8  ;;  %v476_v13 = vpop.f32.mrb[2].mxu1 }
 0x1e7   :  { %vm479_vm2 = vcmp.gt.f32.partialorder %v473_v10, 0.0  ;;  %v481_v14 = vmul.f32 0.01, %v473_v10  ;;  %v477_v15 = vpop.f32.mrb[3].mxu1 }
 0x1e8   :  { %vm480_vm3 = vcmp.gt.f32.partialorder %v475_v12, 0.0  ;;  %v482_v16 = vmul.f32 0.01, %v475_v12 }
 0x1e9   :  { %v483_v17 = vsel %vm479_vm2, %v473_v10, %v481_v14 }
 0x1ea   :  { %v484_v18 = vsel %vm480_vm3, %v475_v12, %v482_v16  ;;  %v485_v20 = vpack.c.bf16 %v483_v17, %v483_v17 }
 0x1eb   :  { %v486_v19 = vpack.c.bf16 %v484_v18, %v484_v18 }
 0x1ed   :  { %519 = vmatprep.mubr.bf16.mxu0 %v486_v19 }
 0x1ee   :  { %520 = vmatmul.mubr.bf16.vlgmr.msra.gmra.mrb[4].mxu0 %v485_v20 }
 0x1ef   :  { %817 = vmatpush3.bf16.msra.mxu0 %v916_v22 }
 0x1f0   :  { %818 = vmatprep.subr.bf16.mxu0 %v917_v23 }
 0x1f3   :  { %819 = vmatpush3.bf16.msra.mxu0 %v918_v24 }
 0x1f4   :  { %820 = vmatprep.subr.bf16.mxu0 %v919_v25 }
 0x1f7   :  { %821 = vmatpush3.bf16.msra.mxu0 %v920_v26 }
 0x1f8   :  { %822 = vmatprep.subr.bf16.mxu0 %v921_v27 }
 0x1fb   :  { %823 = vmatpush3.bf16.msra.mxu0 %v922_v28 }
 0x1fc   :  { %824 = vmatprep.subr.bf16.mxu0 %v923_v29 }
 0x1ff   :  { %825 = vmatpush3.bf16.msra.mxu0 %v924_v30 }
 0x200   :  { %826 = vmatprep.subr.bf16.mxu0 %v925_v31 }
 0x203   :  { %827 = vmatpush3.bf16.msra.mxu0 %v926_v32 }
 0x204   :  { %828 = vmatprep.subr.bf16.mxu0 %v927_v45 }
 0x207   :  { %829 = vmatpush3.bf16.msra.mxu0 %v928_v46 }
 0x208   :  { %830 = vmatprep.subr.bf16.mxu0 %v929_v47 }
 0x20b   :  { %831 = vmatpush3.bf16.msra.mxu0 %v930_v48 }
 0x2c1   :  { %v521_v33 = vpop.f32.mrb[4].mxu0 }
 0x2c2   :  { %v522_v34 = vadd.f32 %v521_v33, %v1237_v7  ;;  %v523_v35 = vpop.f32.mrb[5].mxu0 }
 0x2c3   :  { %v524_v36 = vadd.f32 %v523_v35, %v1239_v8  ;;  %v525_v37 = vpop.f32.mrb[6].mxu0 }
 0x2c4   :  { %vm528_vm4 = vcmp.gt.f32.partialorder %v522_v34, 0.0  ;;  %v530_v38 = vmul.f32 0.01, %v522_v34  ;;  %v526_v39 = vpop.f32.mrb[7].mxu0 }
 0x2c5   :  { %vm529_vm5 = vcmp.gt.f32.partialorder %v524_v36, 0.0  ;;  %v531_v40 = vmul.f32 0.01, %v524_v36 }
 0x2c6   :  { %v532_v41 = vsel %vm528_vm4, %v522_v34, %v530_v38 }
 0x2c7   :  { %v533_v42 = vsel %vm529_vm5, %v524_v36, %v531_v40  ;;  %v534_v44 = vpack.c.bf16 %v532_v41, %v532_v41 }
 0x2c8   :  { %v535_v43 = vpack.c.bf16 %v533_v42, %v533_v42 }
 0x2ca   :  { %568 = vmatprep.mubr.bf16.mxu1 %v535_v43 }
 0x2cb   :  { %569 = vmatmul.mubr.bf16.vlgmr.msra.gmra.mrb[4].mxu1 %v534_v44 }
 0x39e   :  { %v570_v49 = vpop.f32.mrb[4].mxu1 }
 0x39f   :  { %v571_v50 = vadd.f32 %v570_v49, %v1237_v7  ;;  %v572_v51 = vpop.f32.mrb[5].mxu1 }
 0x3a0   :  { %v573_v52 = vadd.f32 %v572_v51, %v1239_v8  ;;  %v574_v53 = vpop.f32.mrb[6].mxu1 }
 0x3a1   :  { %vm577_vm6 = vcmp.gt.f32.partialorder %v571_v50, 0.0  ;;  %v579_v54 = vmul.f32 0.01, %v571_v50  ;;  %v575_v55 = vpop.f32.mrb[7].mxu1 }
 0x3a2   :  { %vm578_vm7 = vcmp.gt.f32.partialorder %v573_v52, 0.0  ;;  %v580_v56 = vmul.f32 0.01, %v573_v52 }
 0x3a3   :  { %v581_v57 = vsel %vm577_vm6, %v571_v50, %v579_v54 }
 0x3a4   :  { %v582_v58 = vsel %vm578_vm7, %v573_v52, %v580_v56  ;;  %v583_v60 = vpack.c.bf16 %v581_v57, %v581_v57 }
 0x3a5   :  { %v584_v59 = vpack.c.bf16 %v582_v58, %v582_v58 }
 0x3a7   :  { %719 = vmatprep.mubr.bf16.mxu0 %v584_v59 }
 0x3a8   :  { %720 = vmatmul.mubr.bf16.vlgmr.msra.gmra.mrb[8].mxu0 %v583_v60 }
 0x47b   :  { %v832_v61 = vpop.f32.mrb[8].mxu0 }
 0x47c   :  { %v833_v63 = vpop.f32.mrb[9].mxu0 }
 0x47d   :  { %v834_v0 = vadd.f32 %v833_v63, %v832_v61  ;;  %v835_v1 = vpop.f32.mrb[10].mxu0 }
 0x47e   :  { %v836_v2 = vpop.f32.mrb[11].mxu0 }
 0x47f   :  { %v722_v3 = vadd.f32 %v834_v0, %v798_v62 }
 0x481   :  { %v815_v4 = vmul.f32 -1.442695, %v722_v3 }
 0x483   :  { %931 = vpow2.f32 %v815_v4 }
 0x48d   :  { %v932_v5 = vpop.eup %931 }
 0x48e   :  { %v730_v6 = vadd.f32 1.0, %v932_v5 }
 0x490   :  { %933 = vrcp.f32 %v730_v6 }
 0x49a   :  { %v934_v7 = vpop.eup %933 }
 0x49b   :  { %734 = vst.msk [vmem:[#allocation5] sm:$0xff] %vm733_vm8, %v934_v7 }
 0x49c   :  { %968 = shalt.err (!%p965_p12)
}
 0x49d   :  { %s969_s10 = scalar_lea.hbm %s1317_s7, 128 }
 0x49e   :  { %p970_p13 = scmp.ne.s32.totalorder %s1317_s7, %s969_s10  ;;  %p973_p0 = scmp.lt.u32.totalorder %s969_s10, %s1317_s7 }
 0x4a0   :  { %p975_p1 = pnand %p973_p0, %p970_p13 }
 0x4a2   :  { %978 = shalt.err (!%p975_p1)
}
 0x4a3   :  { %744 = dma.vmem_to_hbm [thread:$0]  %s742_s30, 128, %s1317_s7, [#allocation4]  }
 0x4a4   :  { %981 = dma.done.wait [#allocation4], 128  }
 0x4a5   :  { %982 = vsyncadd [#allocation4], 4294967168 }
 0x4a6   :  { %748 = vsyncpa [#allocation3], 1 }
 0x4a7   :  { %749 = vsyncpa [#allocation4], 1 }

</bundles_post_ra>
